<compile_context>
chip_gen: v7x
topology: tpu7x:2x2x1
jax: 0.10.0
libtpu: 0.0.40
codegen_flags: <defaults>
</compile_context>

<pallas_src>
import functools

import jax
import jax.numpy as jnp
from jax.experimental import pallas as pl
from jax.experimental.pallas import tpu as pltpu


def gather_excite_kernel(x_ref, w1_ref, b1_ref, a1_ref, w2t_ref, b2_ref, o_ref,
                         *, inv_s):
    # x block: (Nb, C, S) in the original dtype.
    x = x_ref[...]

    # --- Gather: global average pool over the flattened spatial axis ---------
    # Accumulate in f32 without materializing a full f32 copy of the block.
    mean = jnp.sum(x, axis=-1, dtype=jnp.float32) * inv_s           # (Nb, C)

    # --- Excite: two tiny 1x1x1 convs + PReLU, computed on the VPU -----------
    # y1[b, r] = sum_c w1[r, c] * mean[b, c] + b1[r]
    y1 = jnp.sum(mean[:, None, :] * w1_ref[...][None, :, :], axis=-1)   # (Nb, Cr)
    y1 = y1 + b1_ref[...]
    y1 = jnp.where(y1 >= 0.0, y1, a1_ref[...] * y1)                 # PReLU
    # y2[b, c] = sum_r w2[c, r] * y1[b, r] + b2[c]   (w2 passed transposed)
    y2 = jnp.sum(y1[:, :, None] * w2t_ref[...][None, :, :], axis=1)     # (Nb, C)
    y2 = y2 + b2_ref[...]

    # --- Sigmoid gate, broadcast multiply in the input dtype ------------------
    gate = jax.nn.sigmoid(y2).astype(x.dtype)                       # (Nb, C)
    o_ref[...] = (x * gate[:, :, None]).astype(o_ref.dtype)


def _pick_batch_tile(n, per_batch_bytes, target_bytes):
    """Largest divisor of n whose block fits target_bytes (Nb=1 always allowed).

    If the resulting grid would have an odd number of steps (>1), prefer an
    even step count when it costs at most a 2x smaller block (v7x 2-TC split).
    """
    fits = [nb for nb in range(1, n + 1)
            if n % nb == 0 and (nb == 1 or nb * per_batch_bytes <= target_bytes)]
    best = max(fits)
    steps = n // best
    if steps > 1 and steps % 2 == 1:
        even = [nb for nb in fits if (n // nb) % 2 == 0 and 2 * nb >= best]
        if even:
            best = max(even)
    return best


def gather_excite(x, w1, b1, alpha, w2, b2, *,
                  target_block_bytes=8 * 1024 * 1024, donate_x=False):
    """x: (N, C, D, H, W). w1: (Cr, C), b1/alpha: (Cr,), w2: (C, Cr), b2: (C,)."""
    N, C, D, H, W = x.shape
    S = D * H * W
    Cr = w1.shape[0]

    # No pad / slice round trip: (Nb, C, S) blocks use the full last-two dims.
    # TODO(synk): for very small S (< 128) a lane-dense (N, C*S) store layout
    # would avoid masked partial stores; not needed for typical volumes.
    x_flat = x.reshape(N, C, S)

    itemsize = jnp.dtype(x.dtype).itemsize
    per_batch_bytes = C * S * itemsize
    Nb = _pick_batch_tile(N, per_batch_bytes, target_block_bytes)
    grid_n = N // Nb
    block_bytes = Nb * per_batch_bytes

    # VMEM budget: in + out blocks double-buffered, worst-case f32 reduce temp
    # for sub-32-bit inputs, plus headroom for params / Mosaic scratch.
    f32_temp = Nb * C * S * 4 if itemsize < 4 else 0
    needed = 4 * block_bytes + f32_temp + (4 << 20)
    vmem_limit = int(max(32 << 20, min(56 << 20, needed)))   # <=56 MiB: v7x-safe
    # TODO(synk): if a single batch slice alone overflows this budget (huge C*S),
    # a two-pass spatial-split path (reduce kernel + gate kernel) is needed.

    kernel = functools.partial(gather_excite_kernel, inv_s=1.0 / S)

    out_flat = pl.pallas_call(
        kernel,
        out_shape=jax.ShapeDtypeStruct((N, C, S), x.dtype),
        grid_spec=pltpu.PrefetchScalarGridSpec(
            num_scalar_prefetch=0,
            grid=(grid_n,),
            in_specs=[
                pl.BlockSpec((Nb, C, S), lambda n: (n, 0, 0)),   # x (Nb batches)
                # Constant-index param blocks: fetched once (index never changes).
                pl.BlockSpec((Cr, C), lambda n: (0, 0)),          # W1
                pl.BlockSpec((1, Cr), lambda n: (0, 0)),          # b1
                pl.BlockSpec((1, Cr), lambda n: (0, 0)),          # PReLU alpha
                pl.BlockSpec((Cr, C), lambda n: (0, 0)),          # W2^T
                pl.BlockSpec((1, C), lambda n: (0, 0)),           # b2
            ],
            out_specs=pl.BlockSpec((Nb, C, S), lambda n: (n, 0, 0)),
        ),
        compiler_params=pltpu.CompilerParams(
            dimension_semantics=("parallel",),
            vmem_limit_bytes=vmem_limit,
        ),
        # Optional: donate x's HBM buffer (block is fully read before written).
        input_output_aliases=({0: 0} if donate_x else {}),
    )(x_flat,
      w1,
      b1.reshape(1, Cr),
      alpha.reshape(1, Cr),
      w2.T,
      b2.reshape(1, C))

    return out_flat.reshape(N, C, D, H, W)


def gather_excite_ref(x, w1, b1, alpha, w2, b2):
    """Pure-JAX reference matching the PyTorch forward."""
    mean = jnp.mean(x.astype(jnp.float32), axis=(2, 3, 4))          # (N, C)
    y1 = mean @ w1.T + b1                                           # (N, Cr)
    y1 = jnp.where(y1 >= 0.0, y1, alpha * y1)
    y2 = y1 @ w2.T + b2                                             # (N, C)
    gate = jax.nn.sigmoid(y2)[:, :, None, None, None]
    return (x.astype(jnp.float32) * gate).astype(x.dtype)


def _run_case(seed, N, C, D, H, W, reduction=16):
    Cr = C // reduction
    key = jax.random.PRNGKey(seed)
    kx, k1, kb1, k2, kb2 = jax.random.split(key, 5)

    x = jax.random.normal(kx, (N, C, D, H, W), dtype=jnp.float32)

    # Deterministic synthetic parameters (Conv3d 1x1x1 weights squeezed to 2D).
    w1 = jax.random.normal(k1, (Cr, C), dtype=jnp.float32) * (1.0 / jnp.sqrt(C))
    b1 = jax.random.normal(kb1, (Cr,), dtype=jnp.float32) * 0.1
    alpha = jnp.full((Cr,), 0.25, dtype=jnp.float32)    # PReLU default init
    w2 = jax.random.normal(k2, (C, Cr), dtype=jnp.float32) * (1.0 / jnp.sqrt(Cr))
    b2 = jax.random.normal(kb2, (C,), dtype=jnp.float32) * 0.1

    out = gather_excite(x, w1, b1, alpha, w2, b2)
    out = jax.block_until_ready(out)

    ref = gather_excite_ref(x, w1, b1, alpha, w2, b2)
    assert out.shape == x.shape and out.dtype == x.dtype
    assert jnp.allclose(out, ref, atol=1e-5, rtol=1e-5), \
        f"mismatch vs reference for shape {(N, C, D, H, W)}"


if __name__ == "__main__":
    # Small shapes consistent with the module: channels=32, reduction=16 -> Cr=2.
    # Case 1: S = 4*8*8 = 256 (multiple of 128).
    _run_case(0, N=2, C=32, D=4, H=8, W=8)
    # Case 2: S = 3*5*7 = 105 (NOT a multiple of 128) -> exercises the
    # no-pad masked-tail-store path.
    _run_case(0, N=2, C=32, D=3, H=5, W=7)

    print("KERNEL_OK")
</pallas_src>

<mosaic_0001>
module attributes {stable_mosaic.version = 11 : i64} {
  func.func @gather_excite_kernel(%arg0: i32, %arg1: memref<2x32x256xf32, #tpu.memory_space<vmem>>, %arg2: memref<2x32xf32, #tpu.memory_space<vmem>>, %arg3: memref<1x2xf32, #tpu.memory_space<vmem>>, %arg4: memref<1x2xf32, #tpu.memory_space<vmem>>, %arg5: memref<2x32xf32, #tpu.memory_space<vmem>>, %arg6: memref<1x32xf32, #tpu.memory_space<vmem>>, %arg7: memref<2x32x256xf32, #tpu.memory_space<vmem>>) attributes {dimension_semantics = [#tpu.dimension_semantics<parallel>], iteration_bounds = array<i64: 1>, scalar_prefetch = 0 : i64, scratch_operands = 0 : i64, tpu.core_type = #tpu.core_type<tc>, window_params = [{transform_indices = @transform_0, window_bounds = array<i64: 2, 32, 256>}, {pipeline_mode = #tpu.pipeline_mode<synchronous>, transform_indices = @transform_1, window_bounds = array<i64: 2, 32>}, {pipeline_mode = #tpu.pipeline_mode<synchronous>, transform_indices = @transform_2, window_bounds = array<i64: 1, 2>}, {pipeline_mode = #tpu.pipeline_mode<synchronous>, transform_indices = @transform_3, window_bounds = array<i64: 1, 2>}, {pipeline_mode = #tpu.pipeline_mode<synchronous>, transform_indices = @transform_4, window_bounds = array<i64: 2, 32>}, {pipeline_mode = #tpu.pipeline_mode<synchronous>, transform_indices = @transform_5, window_bounds = array<i64: 1, 32>}, {transform_indices = @transform_6, window_bounds = array<i64: 2, 32, 256>}]} {
    %c0 = arith.constant 0 : index
    %c0_0 = arith.constant 0 : index
    %c0_1 = arith.constant 0 : index
    %0 = vector.load %arg1[%c0, %c0_0, %c0_1] : memref<2x32x256xf32, #tpu.memory_space<vmem>>, vector<2x32x256xf32>
    %cst = arith.constant dense<0.000000e+00> : vector<2x32xf32>
    %1 = vector.multi_reduction <add>, %0, %cst [2] : vector<2x32x256xf32> to vector<2x32xf32>
    %cst_2 = arith.constant 3.906250e-03 : f32
    %2 = vector.broadcast %cst_2 : f32 to vector<2x32xf32>
    %3 = arith.mulf %1, %2 : vector<2x32xf32>
    %4 = vector.shape_cast %3 : vector<2x32xf32> to vector<2x1x32xf32>
    %c0_3 = arith.constant 0 : index
    %c0_4 = arith.constant 0 : index
    %5 = vector.load %arg2[%c0_3, %c0_4] : memref<2x32xf32, #tpu.memory_space<vmem>>, vector<2x32xf32>
    %6 = vector.shape_cast %5 : vector<2x32xf32> to vector<1x2x32xf32>
    %7 = vector.broadcast %4 : vector<2x1x32xf32> to vector<2x2x32xf32>
    %8 = vector.broadcast %6 : vector<1x2x32xf32> to vector<2x2x32xf32>
    %9 = arith.mulf %7, %8 : vector<2x2x32xf32>
    %cst_5 = arith.constant dense<0.000000e+00> : vector<2x2xf32>
    %10 = vector.multi_reduction <add>, %9, %cst_5 [2] : vector<2x2x32xf32> to vector<2x2xf32>
    %c0_6 = arith.constant 0 : index
    %c0_7 = arith.constant 0 : index
    %11 = vector.load %arg3[%c0_6, %c0_7] : memref<1x2xf32, #tpu.memory_space<vmem>>, vector<1x2xf32>
    %12 = vector.broadcast %11 : vector<1x2xf32> to vector<2x2xf32>
    %13 = arith.addf %10, %12 : vector<2x2xf32>
    %cst_8 = arith.constant 0.000000e+00 : f32
    %14 = vector.broadcast %cst_8 : f32 to vector<2x2xf32>
    %15 = arith.cmpf oge, %13, %14 : vector<2x2xf32>
    %c0_9 = arith.constant 0 : index
    %c0_10 = arith.constant 0 : index
    %16 = vector.load %arg4[%c0_9, %c0_10] : memref<1x2xf32, #tpu.memory_space<vmem>>, vector<1x2xf32>
    %17 = vector.broadcast %16 : vector<1x2xf32> to vector<2x2xf32>
    %18 = arith.mulf %17, %13 : vector<2x2xf32>
    %19 = arith.select %15, %13, %18 : vector<2x2xi1>, vector<2x2xf32>
    %20 = vector.shape_cast %19 : vector<2x2xf32> to vector<2x2x1xf32>
    %c0_11 = arith.constant 0 : index
    %c0_12 = arith.constant 0 : index
    %21 = vector.load %arg5[%c0_11, %c0_12] : memref<2x32xf32, #tpu.memory_space<vmem>>, vector<2x32xf32>
    %22 = vector.shape_cast %21 : vector<2x32xf32> to vector<1x2x32xf32>
    %23 = vector.broadcast %20 : vector<2x2x1xf32> to vector<2x2x32xf32>
    %24 = vector.broadcast %22 : vector<1x2x32xf32> to vector<2x2x32xf32>
    %25 = arith.mulf %23, %24 : vector<2x2x32xf32>
    %cst_13 = arith.constant dense<0.000000e+00> : vector<2x32xf32>
    %26 = vector.multi_reduction <add>, %25, %cst_13 [1] : vector<2x2x32xf32> to vector<2x32xf32>
    %c0_14 = arith.constant 0 : index
    %c0_15 = arith.constant 0 : index
    %27 = vector.load %arg6[%c0_14, %c0_15] : memref<1x32xf32, #tpu.memory_space<vmem>>, vector<1x32xf32>
    %28 = vector.broadcast %27 : vector<1x32xf32> to vector<2x32xf32>
    %29 = arith.addf %26, %28 : vector<2x32xf32>
    %30 = arith.negf %29 : vector<2x32xf32>
    %31 = math.exp %30 : vector<2x32xf32>
    %cst_16 = arith.constant 1.000000e+00 : f32
    %32 = vector.broadcast %cst_16 : f32 to vector<2x32xf32>
    %33 = arith.addf %32, %31 : vector<2x32xf32>
    %34 = arith.divf %32, %33 : vector<2x32xf32>
    %35 = vector.shape_cast %34 : vector<2x32xf32> to vector<2x32x1xf32>
    %36 = vector.broadcast %35 : vector<2x32x1xf32> to vector<2x32x256xf32>
    %37 = arith.mulf %0, %36 : vector<2x32x256xf32>
    %c0_17 = arith.constant 0 : index
    %c0_18 = arith.constant 0 : index
    %c0_19 = arith.constant 0 : index
    %38 = vector.load %arg7[%c0_17, %c0_18, %c0_19] : memref<2x32x256xf32, #tpu.memory_space<vmem>>, vector<2x32x256xf32>
    tpu.vector_store %arg7[%c0_17, %c0_18, %c0_19], %37 {strides = array<i32>} : memref<2x32x256xf32, #tpu.memory_space<vmem>>, vector<2x32x256xf32>,
    return
  }
  func.func @transform_0(%arg0: i32) -> (i32, i32, i32) {
    %c0_i32 = arith.constant 0 : i32
    %c0_i32_0 = arith.constant 0 : i32
    %c0_i32_1 = arith.constant 0 : i32
    return %arg0, %c0_i32, %c0_i32_0 : i32, i32, i32
  }
  func.func @transform_1(%arg0: i32) -> (i32, i32) {
    %c0_i32 = arith.constant 0 : i32
    %c0_i32_0 = arith.constant 0 : i32
    %c0_i32_1 = arith.constant 0 : i32
    return %c0_i32, %c0_i32_0 : i32, i32
  }
  func.func @transform_2(%arg0: i32) -> (i32, i32) {
    %c0_i32 = arith.constant 0 : i32
    %c0_i32_0 = arith.constant 0 : i32
    %c0_i32_1 = arith.constant 0 : i32
    return %c0_i32, %c0_i32_0 : i32, i32
  }
  func.func @transform_3(%arg0: i32) -> (i32, i32) {
    %c0_i32 = arith.constant 0 : i32
    %c0_i32_0 = arith.constant 0 : i32
    %c0_i32_1 = arith.constant 0 : i32
    return %c0_i32, %c0_i32_0 : i32, i32
  }
  func.func @transform_4(%arg0: i32) -> (i32, i32) {
    %c0_i32 = arith.constant 0 : i32
    %c0_i32_0 = arith.constant 0 : i32
    %c0_i32_1 = arith.constant 0 : i32
    return %c0_i32, %c0_i32_0 : i32, i32
  }
  func.func @transform_5(%arg0: i32) -> (i32, i32) {
    %c0_i32 = arith.constant 0 : i32
    %c0_i32_0 = arith.constant 0 : i32
    %c0_i32_1 = arith.constant 0 : i32
    return %c0_i32, %c0_i32_0 : i32, i32
  }
  func.func @transform_6(%arg0: i32) -> (i32, i32, i32) {
    %c0_i32 = arith.constant 0 : i32
    %c0_i32_0 = arith.constant 0 : i32
    %c0_i32_1 = arith.constant 0 : i32
    return %arg0, %c0_i32, %c0_i32_0 : i32, i32, i32
  }
}

</mosaic_0001>

<bundles_post_ra>
// kernel: tpu_custom_call.1
= control target key start
LH: loop header
LB: loop body
LE: loop exit
PB: predicated region body
PF: predicated region fallthrough
CT: control target
= control target key end

     0   :  { %11 = vsyncpa [#allocation3], 0  ;;  %s768_s0 = inlined_call_operand.hbm [shape: f32[2,32,256], index: 0, kind: input, shape index: {}]   ;;  %s769_s1 = inlined_call_operand.vmem [shape: f32[2,32], index: 1, kind: input, shape index: {}]   ;;  %s770_s2 = inlined_call_operand.vmem [shape: f32[1,2], index: 2, kind: input, shape index: {}]   ;;  %s771_s3 = inlined_call_operand.vmem [shape: f32[1,2], index: 3, kind: input, shape index: {}]   ;;  %s772_s4 = inlined_call_operand.vmem [shape: f32[2,32], index: 4, kind: input, shape index: {}]   ;;  %s773_s5 = inlined_call_operand.vmem [shape: f32[1,32], index: 5, kind: input, shape index: {}]   ;;  %s774_s6 = inlined_call_operand.hbm [shape: f32[2,32,256], index: 6, kind: output, shape index: {}]  }
   0x1   :  { %12 = vsyncpa [#allocation4], 0  ;;  %s572_s21 = smov [#allocation2]   ;;  %s524_s25 = scalar_lea.hbm %s768_s0, 2048 }
   0x2   :  { %s18_s22 = sshll.u32 %s572_s21, 4  ;;  %p525_p0 = scmp.ne.s32.totalorder %s768_s0, %s524_s25  ;;  %s19_s22 = int_to_ptr.vmem [resolvable:$true] %s18_s22 }
   0x3   :  { %p528_p1 = scmp.lt.u32.totalorder %s524_s25, %s768_s0 }
   0x5   :  { %p530_p2 = pnand %p528_p1, %p525_p0 }
   0x7   :  { %533 = shalt.err (!%p530_p2)
}
   0x8   :  { %s534_s30 = scalar_lea.vmem %s19_s22, 2048  ;;  %p539_p4 = scmp.lt.s32.totalorder %s19_s22, %s19_s22 }
   0x9   :  { %p535_p3 = scmp.ne.s32.totalorder %s19_s22, %s534_s30  ;;  %p540_p5 = scmp.lt.s32.totalorder %s534_s30, %s534_s30 }
   0xb   :  { %p541_p6 = por %p540_p5, %p539_p4 }
   0xd   :  { %p542_p7 = pnand %p541_p6, %p535_p3 }
   0xf   :  { %545 = shalt.err (!%p542_p7)
}
  0x10   :  { %s573_s7 = smov 256   ;;  %s574_s8 = smov 16  }
  0x11   :  { %24 = dma.hbm_to_vmem [thread:$0]  %s768_s0, 2048, %s19_s22, [#allocation3], %s573_s7, %s573_s7, %s574_s8  }
  0x12   :  { %568 = dma.done.wait [#allocation3], 2048  }
  0x13   :  { %569 = vsyncadd [#allocation3], 4294965248  ;;  %v627_v0 = vld [vmem:[#allocation2 + $0x40] sm:$0xff]  ;;  %v629_v1 = vld [vmem:[#allocation2 + $0x48] sm:$0xff]  ;;  %v88_v24 = vlaneseq  ;;  %v575_v31 = vmov 0   ;;  %vm225_vm0 = vcmask 130112  }
  0x14   :  { %v631_v2 = vld [vmem:[#allocation2] sm:$0xff]  ;;  %v66_v3 = vadd.f32 %v629_v1, %v627_v0  ;;  %v635_v4 = vld [vmem:[#allocation2 + $0x8] sm:$0xff]  ;;  %v637_v5 = vld [vmem:[#allocation2 + $0x50] sm:$0xff]  ;;  %515 = vset.pattern.permute.xlu1 %v575_v31  ;;  %514 = vset.pattern.permute.xlu0 %v575_v31  ;;  %vm232_vm1 = vcmask 195712   ;;  %vm239_vm2 = vcmask 261312   ;;  %vm298_vm3 = vcmask 1041409  }
  0x15   :  { %v639_v6 = vld [vmem:[#allocation2 + $0x58] sm:$0xff]  ;;  %v54_v7 = vadd.f32 %v635_v4, %v631_v2  ;;  %v643_v8 = vld [vmem:[#allocation2 + $0x10] sm:$0xff]  ;;  %v651_v12 = vld [vmem:[#allocation2 + $0x60] sm:$0xff]  ;;  %v676_v25 = vshrl.u32 %v88_v24, 7  ;;  %vm303_vm4 = vcmask 254976  }
  0x16   :  { %v645_v9 = vld [vmem:[#allocation2 + $0x18] sm:$0xff]  ;;  %67 = vadd.xlane.f32.xlu1 %v66_v3  ;;  %v69_v10 = vadd.f32 %v639_v6, %v637_v5  ;;  %v653_v13 = vld [vmem:[#allocation2 + $0x68] sm:$0xff]  ;;  %v655_v14 = vld [vmem:[#allocation2 + $0x20] sm:$0xff] }
  0x17   :  { %55 = vadd.xlane.f32.xlu0 %v54_v7  ;;  %v57_v11 = vadd.f32 %v645_v9, %v643_v8  ;;  %v657_v15 = vld [vmem:[#allocation2 + $0x28] sm:$0xff]  ;;  %v72_v16 = vadd.f32 %v653_v13, %v651_v12  ;;  %v663_v18 = vld [vmem:[#allocation2 + $0x70] sm:$0xff]  ;;  %v665_v19 = vld [vmem:[#allocation2 + $0x78] sm:$0xff]  ;;  %v679_v26 = vsub.s32 0, %v676_v25  ;;  %v109_v29 = vsub.s32 1, %v676_v25 }
  0x18   :  { %v60_v17 = vadd.f32 %v657_v15, %v655_v14  ;;  %v667_v20 = vld [vmem:[#allocation2 + $0x30] sm:$0xff]  ;;  %v669_v21 = vld [vmem:[#allocation2 + $0x38] sm:$0xff]  ;;  %v75_v22 = vadd.f32 %v665_v19, %v663_v18  ;;  %v86_v27 = vld [vmem:[%s769_s1] sm:$0x3] }
  0x19   :  { %v63_v23 = vadd.f32 %v669_v21, %v667_v20  ;;  %v91_v28 = vrot.slane %v86_v27, %v679_v26  ;;  %v110_v30 = vrot.slane %v86_v27, %v109_v29 }
  0x1a   :  { %70 = vadd.xlane.f32.xlu1 %v69_v10 }
  0x1b   :  { %58 = vadd.xlane.f32.xlu0 %v57_v11 }
  0x1e   :  { %73 = vadd.xlane.f32.xlu1 %v72_v16 }
  0x1f   :  { %61 = vadd.xlane.f32.xlu0 %v60_v17 }
  0x22   :  { %76 = vadd.xlane.f32.xlu1 %v75_v22 }
  0x23   :  { %64 = vadd.xlane.f32.xlu0 %v63_v23 }
  0x33   :  { %97 = vbcast.lane.b32.xlu1 %v91_v28, 264 }
  0x37   :  { %112 = vbcast.lane.b32.xlu1 %v110_v30, 256 }
  0x39   :  { %93 = vbcast.lane.b32.xlu0 %v91_v28, 256 }
  0x3b   :  { %116 = vbcast.lane.b32.xlu1 %v110_v30, 264 }
  0x3d   :  { %101 = vbcast.lane.b32.xlu0 %v91_v28, 272 }
  0x3f   :  { %120 = vbcast.lane.b32.xlu1 %v110_v30, 272 }
  0x41   :  { %105 = vbcast.lane.b32.xlu0 %v91_v28, 280 }
  0x43   :  { %124 = vbcast.lane.b32.xlu1 %v110_v30, 280 }
  0xa3   :  { %v68_v32 = vpop.xlane.xlu1 %67 }
  0xa4   :  { %v56_v33 = vpop.xlane.xlu0 %55  ;;  %v82_v48 = vmul.f32 0.00390625, %v68_v32 }
  0xa5   :  { %v78_v41 = vmul.f32 0.00390625, %v56_v33  ;;  %v215_v33 = vand.u32 127, %v88_v24 }
  0xa7   :  { %v71_v34 = vpop.xlane.xlu1 %70 }
  0xa8   :  { %v59_v35 = vpop.xlane.xlu0 %58  ;;  %v83_v52 = vmul.f32 0.00390625, %v71_v34 }
  0xa9   :  { %v79_v40 = vmul.f32 0.00390625, %v59_v35 }
  0xab   :  { %v74_v36 = vpop.xlane.xlu1 %73 }
  0xac   :  { %v62_v37 = vpop.xlane.xlu0 %61  ;;  %v84_v60 = vmul.f32 0.00390625, %v74_v36  ;;  %v220_v36 = vadd.s32 4294967288, %v215_v33 }
  0xad   :  { %v80_v56 = vmul.f32 0.00390625, %v62_v37 }
  0xaf   :  { %v77_v38 = vpop.xlane.xlu1 %76 }
  0xb0   :  { %v65_v39 = vpop.xlane.xlu0 %64  ;;  %v85_v16 = vmul.f32 0.00390625, %v77_v38 }
  0xb1   :  { %v81_v3 = vmul.f32 0.00390625, %v65_v39  ;;  %v227_v39 = vadd.s32 4294967280, %v215_v33 }
  0xb3   :  { %v98_v42 = vpop.permute.xlu1 %97 }
  0xb4   :  { %v135_v43 = vmul.f32 %v98_v42, %v79_v40  ;;  %v94_v44 = vpop.permute.xlu0 %93  ;;  %v143_v53 = vmul.f32 %v98_v42, %v83_v52  ;;  %v691_v42 = vsub.s32 %v215_v33, %v676_v25 }
  0xb5   :  { %v134_v45 = vmul.f32 %v94_v44, %v78_v41  ;;  %v142_v50 = vmul.f32 %v94_v44, %v82_v48 }
  0xb6   :  { %170 = vperm.xlu1 %515, %v135_v43  }
  0xb7   :  { %167 = vperm.xlu0 %514, %v134_v45   ;;  %v113_v46 = vpop.permute.xlu1 %112  ;;  %v230_v45 = vsub.s32 %v227_v39, %v676_v25  ;;  %v504_v39 = vld [vmem:[%s770_s2] ss:$0 sm:$0xff] }
  0xb8   :  { %v138_v47 = vmul.f32 %v113_v46, %v78_v41  ;;  %v146_v54 = vmul.f32 %v113_v46, %v82_v48  ;;  %v102_v55 = vpop.permute.xlu0 %101  ;;  %v223_v41 = vsub.s32 %v220_v36, %v676_v25 }
  0xb9   :  { %v136_v57 = vmul.f32 %v102_v55, %v80_v56  ;;  %v144_v61 = vmul.f32 %v102_v55, %v84_v60 }
  0xba   :  { %179 = vperm.xlu1 %515, %v138_v47  }
  0xbb   :  { %v117_v49 = vpop.permute.xlu1 %116 }
  0xbc   :  { %v139_v51 = vmul.f32 %v117_v49, %v79_v40  ;;  %v147_v58 = vmul.f32 %v117_v49, %v83_v52  ;;  %v106_v63 = vpop.permute.xlu0 %105  ;;  %v234_v40 = vadd.s32 4294967272, %v215_v33 }
  0xbd   :  { %v137_v7 = vmul.f32 %v106_v63, %v81_v3  ;;  %v145_v17 = vmul.f32 %v106_v63, %v85_v16 }
  0xbe   :  { %191 = vperm.xlu1 %515, %v142_v50   ;;  %182 = vperm.xlu0 %514, %v139_v51   ;;  %v237_v46 = vsub.s32 %v234_v40, %v676_v25 }
  0xbf   :  { %v121_v59 = vpop.permute.xlu1 %120 }
  0xc0   :  { %v140_v62 = vmul.f32 %v121_v59, %v80_v56  ;;  %v148_v10 = vmul.f32 %v121_v59, %v84_v60 }
  0xc2   :  { %203 = vperm.xlu1 %515, %v146_v54   ;;  %194 = vperm.xlu0 %514, %v143_v53  }
  0xc3   :  { %v125_v11 = vpop.permute.xlu1 %124 }
  0xc4   :  { %v141_v22 = vmul.f32 %v125_v11, %v81_v3  ;;  %v149_v23 = vmul.f32 %v125_v11, %v85_v16 }
  0xc6   :  { %206 = vperm.xlu0 %514, %v147_v58   ;;  %173 = vperm.xlu1 %515, %v136_v57  }
  0xca   :  { %185 = vperm.xlu0 %514, %v140_v62   ;;  %197 = vperm.xlu1 %515, %v144_v61  }
  0xce   :  { %209 = vperm.xlu0 %514, %v148_v10   ;;  %176 = vperm.xlu1 %515, %v137_v7  }
  0xd2   :  { %188 = vperm.xlu0 %514, %v141_v22   ;;  %200 = vperm.xlu1 %515, %v145_v17  }
  0xd6   :  { %212 = vperm.xlu0 %514, %v149_v23  }
 0x135   :  { %v171_v27 = vpop.permute.xlu1 %170 }
 0x136   :  { %v168_v28 = vpop.permute.xlu0 %167  ;;  %v224_v47 = vrot.slane %v171_v27, %v223_v41 }
 0x137   :  { %v219_v24 = vrot.slane %v168_v28, %v691_v42 }
 0x139   :  { %v180_v30 = vpop.permute.xlu1 %179  ;;  %v226_v55 = vsel %vm225_vm0, %v224_v47, %v219_v24 }
 0x13a   :  { %v244_v53 = vrot.slane %v180_v30, %v691_v42 }
 0x13d   :  { %v192_v31 = vpop.permute.xlu1 %191  ;;  %v183_v32 = vpop.permute.xlu0 %182 }
 0x13e   :  { %v248_v50 = vrot.slane %v183_v32, %v223_v41  ;;  %v263_v56 = vrot.slane %v192_v31, %v691_v42 }
 0x140   :  { %v249_v59 = vsel %vm225_vm0, %v248_v50, %v244_v53 }
 0x141   :  { %v204_v34 = vpop.permute.xlu1 %203  ;;  %v195_v35 = vpop.permute.xlu0 %194 }
 0x142   :  { %v267_v60 = vrot.slane %v195_v35, %v223_v41  ;;  %v282_v11 = vrot.slane %v204_v34, %v691_v42 }
 0x144   :  { %v268_v28 = vsel %vm225_vm0, %v267_v60, %v263_v56 }
 0x145   :  { %v174_v37 = vpop.permute.xlu1 %173  ;;  %v207_v38 = vpop.permute.xlu0 %206 }
 0x146   :  { %v231_v51 = vrot.slane %v174_v37, %v230_v45  ;;  %v286_v61 = vrot.slane %v207_v38, %v223_v41 }
 0x148   :  { %v233_v63 = vsel %vm232_vm1, %v231_v51, %v226_v55  ;;  %v287_v30 = vsel %vm225_vm0, %v286_v61, %v282_v11 }
 0x149   :  { %v198_v43 = vpop.permute.xlu1 %197  ;;  %v186_v44 = vpop.permute.xlu0 %185 }
 0x14a   :  { %v253_v52 = vrot.slane %v186_v44, %v230_v45  ;;  %v272_v3 = vrot.slane %v198_v43, %v230_v45 }
 0x14c   :  { %v254_v7 = vsel %vm232_vm1, %v253_v52, %v249_v59  ;;  %v273_v33 = vsel %vm232_vm1, %v272_v3, %v268_v28 }
 0x14d   :  { %v177_v48 = vpop.permute.xlu1 %176  ;;  %v210_v49 = vpop.permute.xlu0 %209 }
 0x14e   :  { %v238_v54 = vrot.slane %v177_v48, %v237_v46  ;;  %v291_v10 = vrot.slane %v210_v49, %v230_v45  ;;  %v505_v49 = vld [vmem:[%s771_s3] ss:$0 sm:$0xff] }
 0x150   :  { %v240_v17 = vsel %vm239_vm2, %v238_v54, %v233_v63  ;;  %v292_v35 = vsel %vm232_vm1, %v291_v10, %v287_v30 }
 0x151   :  { %v201_v57 = vpop.permute.xlu1 %200  ;;  %v189_v58 = vpop.permute.xlu0 %188 }
 0x152   :  { %v258_v62 = vrot.slane %v189_v58, %v237_v46  ;;  %v277_v16 = vrot.slane %v201_v57, %v237_v46  ;;  %v369_v57 = vld [vmem:[%s772_s4] sm:$0x3] }
 0x154   :  { %v259_v22 = vsel %vm239_vm2, %v258_v62, %v254_v7  ;;  %v278_v34 = vsel %vm239_vm2, %v277_v16, %v273_v33 }
 0x155   :  { %v213_v23 = vpop.permute.xlu0 %212  ;;  %v299_v27 = vsel %vm298_vm3, %v259_v22, %v240_v17 }
 0x156   :  { %v296_v31 = vrot.slane %v213_v23, %v237_v46  ;;  %v304_v32 = vsel %vm303_vm4, %v299_v27, 0.0  ;;  %v506_v27 = vld [vmem:[%s773_s5] ss:$0 sm:$0xff]  ;;  %s576_s5 = smov [#allocation5]  }
 0x157   :  { %305 = vadd.xlane.f32.xlu1 %v304_v32  ;;  %s492_s16 = sshll.u32 %s576_s5, 4  ;;  %s493_s16 = int_to_ptr.vmem [resolvable:$true] %s492_s16 }
 0x158   :  { %v297_v36 = vsel %vm239_vm2, %v296_v31, %v292_v35  ;;  %s546_s17 = scalar_lea.vmem %s493_s16, 2048  ;;  %p551_p9 = scmp.lt.s32.totalorder %s493_s16, %s493_s16 }
 0x159   :  { %v300_v37 = vsel %vm298_vm3, %v297_v36, %v278_v34  ;;  %p547_p8 = scmp.ne.s32.totalorder %s493_s16, %s546_s17  ;;  %p552_p10 = scmp.lt.s32.totalorder %s546_s17, %s546_s17 }
 0x15a   :  { %v307_v38 = vsel %vm303_vm4, %v300_v37, 0.0 }
 0x15b   :  { %308 = vadd.xlane.f32.xlu0 %v307_v38  ;;  %p553_p11 = por %p552_p10, %p551_p9 }
 0x15d   :  { %p554_p12 = pnand %p553_p11, %p547_p8 }
 0x171   :  { %317 = vbcast.lane.b32.xlu0 %v504_v39, 256 }
 0x1e4   :  { %v306_v41 = vpop.xlane.xlu1 %305 }
 0x1e8   :  { %v309_v40 = vpop.xlane.xlu0 %308 }
 0x1ec   :  { %v318_v43 = vpop.permute.xlu0 %317 }
 0x1ed   :  { %v320_v44 = vadd.f32 %v318_v43, %v306_v41  ;;  %v321_v45 = vadd.f32 %v318_v43, %v309_v40 }
 0x1ef   :  { %334 = vperm.xlu1 %515, %v320_v44   ;;  %vm323_vm5 = vcmp.ge.f32.partialorder %v321_v45, 0.0  ;;  %vm322_vm6 = vcmp.ge.f32.partialorder %v320_v44, 0.0 }
 0x1f3   :  { %337 = vperm.xlu1 %515, %v321_v45  }
 0x26e   :  { %v335_v46 = vpop.permute.xlu1 %334 }
 0x26f   :  { %v342_v24 = vrot.slane %v335_v46, %v691_v42 }
 0x272   :  { %v338_v47 = vpop.permute.xlu1 %337 }
 0x273   :  { %v346_v48 = vrot.slane %v338_v47, %v691_v42 }
 0x275   :  { %v347_v50 = vsel %vm298_vm3, %v346_v48, %v342_v24 }
 0x276   :  { %v349_v51 = vmul.f32 %v505_v49, %v347_v50 }
 0x278   :  { %v361_v52 = vrot.slane %v349_v51, %v109_v29  ;;  %v354_v53 = vrot.slane %v349_v51, %v679_v26 }
 0x27a   :  { %363 = vbcast.lane.b32.xlu1 %v361_v52, 256  ;;  %356 = vbcast.lane.b32.xlu0 %v354_v53, 256 }
 0x2ec   :  { %v364_v54 = vpop.permute.xlu1 %363  ;;  %v357_v55 = vpop.permute.xlu0 %356 }
 0x2ed   :  { %v368_v56 = vsel %vm323_vm5, %v321_v45, %v364_v54  ;;  %v367_v42 = vsel %vm322_vm6, %v320_v44, %v357_v55 }
 0x2ee   :  { %377 = vperm.xlu1 %515, %v368_v56   ;;  %372 = vperm.xlu0 %514, %v367_v42  }
 0x36d   :  { %v378_v58 = vpop.permute.xlu1 %377  ;;  %v373_v59 = vpop.permute.xlu0 %372 }
 0x36e   :  { %v381_v25 = vmul.f32 %v378_v58, %v369_v57  ;;  %v380_v29 = vmul.f32 %v373_v59, %v369_v57 }
 0x370   :  { %v389_v60 = vsel %vm303_vm4, %v381_v25, 0.0  ;;  %v382_v61 = vsel %vm303_vm4, %v380_v29, 0.0 }
 0x371   :  { %v390_v62 = vrot.slane %v389_v60, 4  ;;  %v383_v63 = vrot.slane %v382_v61, 4 }
 0x373   :  { %v391_v3 = vadd.f32 %v390_v62, %v389_v60  ;;  %v384_v7 = vadd.f32 %v383_v63, %v382_v61 }
 0x375   :  { %v392_v10 = vrot.slane %v391_v3, 2  ;;  %v385_v11 = vrot.slane %v384_v7, 2 }
 0x377   :  { %v393_v16 = vadd.f32 %v392_v10, %v391_v3  ;;  %v386_v17 = vadd.f32 %v385_v11, %v384_v7 }
 0x379   :  { %v394_v22 = vrot.slane %v393_v16, 1  ;;  %v387_v23 = vrot.slane %v386_v17, 1 }
 0x37b   :  { %v395_v28 = vadd.f32 %v394_v22, %v393_v16  ;;  %v388_v30 = vadd.f32 %v387_v23, %v386_v17 }
 0x37d   :  { %v404_v31 = vadd.f32 %v506_v27, %v395_v28  ;;  %v403_v32 = vadd.f32 %v506_v27, %v388_v30 }
 0x37f   :  { %v507_v33 = vmul.f32 -1.442695, %v403_v32  ;;  %v508_v35 = vmul.f32 -1.442695, %v404_v31 }
 0x381   :  { %516 = vpow2.f32 %v507_v33 }
 0x382   :  { %518 = vpow2.f32 %v508_v35 }
 0x38b   :  { %v517_v34 = vpop.eup %516 }
 0x38c   :  { %v411_v36 = vadd.f32 1.0, %v517_v34  ;;  %v519_v37 = vpop.eup %518 }
 0x38d   :  { %v412_v38 = vadd.f32 1.0, %v519_v37 }
 0x38e   :  { %520 = vrcp.f32 %v411_v36 }
 0x38f   :  { %522 = vrcp.f32 %v412_v38 }
 0x398   :  { %v521_v39 = vpop.eup %520 }
 0x399   :  { %v420_v40 = vrot.slane %v521_v39, %v679_v26  ;;  %v523_v41 = vpop.eup %522 }
 0x39a   :  { %v439_v43 = vrot.slane %v523_v41, %v679_v26 }
 0x39b   :  { %426 = vbcast.lane.b32.xlu1 %v420_v40, 264  ;;  %422 = vbcast.lane.b32.xlu0 %v420_v40, 256 }
 0x39f   :  { %434 = vbcast.lane.b32.xlu1 %v420_v40, 280  ;;  %430 = vbcast.lane.b32.xlu0 %v420_v40, 272 }
 0x3a3   :  { %445 = vbcast.lane.b32.xlu1 %v439_v43, 264  ;;  %441 = vbcast.lane.b32.xlu0 %v439_v43, 256 }
 0x3a7   :  { %453 = vbcast.lane.b32.xlu1 %v439_v43, 280  ;;  %449 = vbcast.lane.b32.xlu0 %v439_v43, 272 }
 0x40d   :  { %v427_v44 = vpop.permute.xlu1 %426  ;;  %v423_v45 = vpop.permute.xlu0 %422 }
 0x40e   :  { %v457_v46 = vmul.f32 %v427_v44, %v643_v8  ;;  %v458_v47 = vmul.f32 %v427_v44, %v645_v9  ;;  %v455_v24 = vmul.f32 %v423_v45, %v631_v2  ;;  %v456_v48 = vmul.f32 %v423_v45, %v635_v4 }
 0x410   :  { %473 = vst [vmem:[#allocation5 + $0x10] sm:$0xff] %v457_v46  ;;  %474 = vst [vmem:[#allocation5 + $0x18] sm:$0xff] %v458_v47 }
 0x411   :  { %471 = vst [vmem:[#allocation5] sm:$0xff] %v455_v24  ;;  %472 = vst [vmem:[#allocation5 + $0x8] sm:$0xff] %v456_v48  ;;  %v435_v49 = vpop.permute.xlu1 %434  ;;  %v431_v26 = vpop.permute.xlu0 %430 }
 0x412   :  { %v461_v50 = vmul.f32 %v435_v49, %v667_v20  ;;  %v462_v51 = vmul.f32 %v435_v49, %v669_v21  ;;  %v459_v52 = vmul.f32 %v431_v26, %v655_v14  ;;  %v460_v8 = vmul.f32 %v431_v26, %v657_v15 }
 0x414   :  { %477 = vst [vmem:[#allocation5 + $0x30] sm:$0xff] %v461_v50  ;;  %478 = vst [vmem:[#allocation5 + $0x38] sm:$0xff] %v462_v51 }
 0x415   :  { %475 = vst [vmem:[#allocation5 + $0x20] sm:$0xff] %v459_v52  ;;  %476 = vst [vmem:[#allocation5 + $0x28] sm:$0xff] %v460_v8  ;;  %v446_v2 = vpop.permute.xlu1 %445  ;;  %v442_v4 = vpop.permute.xlu0 %441 }
 0x416   :  { %v465_v9 = vmul.f32 %v446_v2, %v637_v5  ;;  %v466_v53 = vmul.f32 %v446_v2, %v639_v6  ;;  %v463_v54 = vmul.f32 %v442_v4, %v627_v0  ;;  %v464_v20 = vmul.f32 %v442_v4, %v629_v1 }
 0x418   :  { %481 = vst [vmem:[#allocation5 + $0x50] sm:$0xff] %v465_v9  ;;  %482 = vst [vmem:[#allocation5 + $0x58] sm:$0xff] %v466_v53 }
 0x419   :  { %479 = vst [vmem:[#allocation5 + $0x40] sm:$0xff] %v463_v54  ;;  %480 = vst [vmem:[#allocation5 + $0x48] sm:$0xff] %v464_v20  ;;  %v454_v14 = vpop.permute.xlu1 %453  ;;  %v450_v15 = vpop.permute.xlu0 %449 }
 0x41a   :  { %v469_v21 = vmul.f32 %v454_v14, %v663_v18  ;;  %v470_v55 = vmul.f32 %v454_v14, %v665_v19  ;;  %v467_v5 = vmul.f32 %v450_v15, %v651_v12  ;;  %v468_v6 = vmul.f32 %v450_v15, %v653_v13 }
 0x41c   :  { %485 = vst [vmem:[#allocation5 + $0x70] sm:$0xff] %v469_v21  ;;  %486 = vst [vmem:[#allocation5 + $0x78] sm:$0xff] %v470_v55 }
 0x41d   :  { %483 = vst [vmem:[#allocation5 + $0x60] sm:$0xff] %v467_v5  ;;  %484 = vst [vmem:[#allocation5 + $0x68] sm:$0xff] %v468_v6 }
 0x41e   :  { %557 = shalt.err (!%p554_p12)
}
 0x41f   :  { %s558_s20 = scalar_lea.hbm %s774_s6, 2048 }
 0x420   :  { %p559_p13 = scmp.ne.s32.totalorder %s774_s6, %s558_s20  ;;  %p562_p0 = scmp.lt.u32.totalorder %s558_s20, %s774_s6 }
 0x422   :  { %p564_p1 = pnand %p562_p0, %p559_p13 }
 0x424   :  { %567 = shalt.err (!%p564_p1)
}
 0x425   :  { %498 = dma.vmem_to_hbm [thread:$0]  %s493_s16, 2048, %s774_s6, [#allocation4], %s573_s7, %s573_s7, %s574_s8  }
 0x426   :  { %570 = dma.done.wait [#allocation4], 2048  }
 0x427   :  { %571 = vsyncadd [#allocation4], 4294965248 }
 0x428   :  { %502 = vsyncpa [#allocation3], 1 }
 0x429   :  { %503 = vsyncpa [#allocation4], 1 }

</bundles_post_ra>
